<compile_context>
chip_gen: v7x
topology: tpu7x:2x2x1
jax: 0.10.0
libtpu: 0.0.40
codegen_flags: <defaults>
</compile_context>

<pallas_src>
import functools

import jax
import jax.numpy as jnp
from jax.experimental import pallas as pl
from jax.experimental.pallas import tpu as pltpu

INPUT_SIZE = 3 * 32 * 32   # 3072
HIDDEN_SIZE = 128
OUTPUT_SIZE = 10
OUT_PAD = 128              # lane-dense padded output width
MAX_TILE_B = 1024          # f32 x tile @ 1024 rows ~= 24 MiB double-buffered
VMEM_LIMIT = 48 << 20      # fits tb=1024 footprint; < v7x's 64 MiB physical VMEM


def _round_up(x, m):
    return ((x + m - 1) // m) * m


def mlp_kernel(x_ref, w1_ref, b1_ref, w2_ref, b2_ref, o_ref):
    # x arrives in native f32 (single HBM pass); cast to bf16 on-chip right
    # before the MXU -- the VPU cast hides under the streaming DMA.
    x_bf = x_ref[...].astype(jnp.bfloat16)
    # fc1: (tb, 3072) bf16 @ (3072, 128) bf16 -> f32 accumulation on the MXU.
    h = jnp.dot(x_bf, w1_ref[...], preferred_element_type=jnp.float32)
    h = jnp.maximum(h + b1_ref[...], 0.0)              # bias + ReLU (VPU, f32)
    # fc2: bf16 operands, f32 accumulation, lane-dense 128-wide output tile.
    y = jnp.dot(h.astype(jnp.bfloat16), w2_ref[...],
                preferred_element_type=jnp.float32)
    o_ref[...] = (y + b2_ref[...]).astype(o_ref.dtype)  # bf16 lane-dense store


@functools.partial(jax.jit, static_argnames=("tile_b",))
def neural_network_forward(x, w1_bf, b1_f, w2_p, b2_p, *, tile_b=MAX_TILE_B):
    """x: (B, INPUT_SIZE) f32.  Prepared params from prepare_params().
    Returns (B, OUTPUT_SIZE) f32 logits."""
    B = x.shape[0]

    # Tile selection:
    #  * never exceed the batch (rounded to the 8-row sublane granule),
    #  * keep >= 2 grid steps when possible so v7x's 2 TensorCores both work.
    tb = min(tile_b, _round_up(B, 8))
    if B > 8:
        tb = min(tb, max(8, _round_up(pl.cdiv(B, 2), 8)))
    grid = (pl.cdiv(B, tb),)   # ragged edge handled by masked edge tiles

    cost = pl.CostEstimate(
        flops=2 * B * INPUT_SIZE * HIDDEN_SIZE + 2 * B * HIDDEN_SIZE * OUT_PAD,
        transcendentals=0,
        bytes_accessed=(x.size * 4 + w1_bf.size * 2 + b1_f.size * 4
                        + w2_p.size * 2 + b2_p.size * 2 + B * OUT_PAD * 2),
    )

    out = pl.pallas_call(
        mlp_kernel,
        out_shape=jax.ShapeDtypeStruct((B, OUT_PAD), jnp.bfloat16),
        grid_spec=pltpu.PrefetchScalarGridSpec(
            num_scalar_prefetch=0,
            grid=grid,
            in_specs=[
                # x streams over the batch axis in f32.
                pl.BlockSpec((tb, INPUT_SIZE), lambda i: (i, 0)),
                # Weights / biases: constant block index -> fetched once,
                # resident in VMEM across all grid steps.
                pl.BlockSpec((INPUT_SIZE, HIDDEN_SIZE), lambda i: (0, 0)),
                pl.BlockSpec((1, HIDDEN_SIZE), lambda i: (0, 0)),
                pl.BlockSpec((HIDDEN_SIZE, OUT_PAD), lambda i: (0, 0)),
                pl.BlockSpec((1, OUT_PAD), lambda i: (0, 0)),
            ],
            out_specs=pl.BlockSpec((tb, OUT_PAD), lambda i: (i, 0)),
        ),
        compiler_params=pltpu.CompilerParams(
            # Batch tiles are independent -> shard across TCs on v7x.
            dimension_semantics=("parallel",),
            vmem_limit_bytes=VMEM_LIMIT,
        ),
        cost_estimate=cost,
    )(x, w1_bf, b1_f, w2_p, b2_p)

    # Slice off lane padding and upcast the bf16 logits back to f32.
    return out[:, :OUTPUT_SIZE].astype(jnp.float32)


def prepare_params(w1, b1, w2, b2):
    """One-time (outside the hot path) casts / padding of the parameters."""
    w1_bf = w1.astype(jnp.bfloat16)
    b1_f = b1.astype(jnp.float32).reshape(1, HIDDEN_SIZE)
    w2_p = jnp.zeros((HIDDEN_SIZE, OUT_PAD), jnp.bfloat16).at[
        :, :OUTPUT_SIZE].set(w2.astype(jnp.bfloat16))
    b2_p = jnp.zeros((1, OUT_PAD), jnp.bfloat16).at[:, :OUTPUT_SIZE].set(
        b2.astype(jnp.bfloat16).reshape(1, OUTPUT_SIZE))
    return w1_bf, b1_f, w2_p, b2_p


def init_params(key):
    """Deterministic init mimicking nn.Linear's U(-1/sqrt(fan_in), 1/sqrt(fan_in))."""
    k1, k2, k3, k4 = jax.random.split(key, 4)
    bound1 = 1.0 / jnp.sqrt(INPUT_SIZE)
    bound2 = 1.0 / jnp.sqrt(HIDDEN_SIZE)
    # Stored as (in_features, out_features) == PyTorch weight transposed.
    w1 = jax.random.uniform(k1, (INPUT_SIZE, HIDDEN_SIZE), jnp.float32,
                            -bound1, bound1)
    b1 = jax.random.uniform(k2, (1, HIDDEN_SIZE), jnp.float32, -bound1, bound1)
    w2 = jax.random.uniform(k3, (HIDDEN_SIZE, OUTPUT_SIZE), jnp.float32,
                            -bound2, bound2)
    b2 = jax.random.uniform(k4, (1, OUTPUT_SIZE), jnp.float32, -bound2, bound2)
    return w1, b1, w2, b2


def _reference(x, w1, b1, w2, b2):
    return jnp.maximum(x @ w1 + b1, 0.0) @ w2 + b2


if __name__ == "__main__":
    key = jax.random.PRNGKey(0)
    kx, kp = jax.random.split(key)
    w1, b1, w2, b2 = init_params(kp)
    w1_bf, b1_f, w2_p, b2_p = prepare_params(w1, b1, w2, b2)

    # Small-batch path (single grid step, exact block).
    B = 8
    x = jax.random.normal(kx, (B, INPUT_SIZE), jnp.float32)
    out = jax.block_until_ready(
        neural_network_forward(x, w1_bf, b1_f, w2_p, b2_p))
    ref = _reference(x, w1, b1, w2, b2)
    assert out.shape == (B, OUTPUT_SIZE), out.shape
    # fc1/fc2 run in bf16 (f32 accumulation) -> loosened tolerance vs f32 ref.
    err = float(jnp.max(jnp.abs(out - ref)))
    assert jnp.allclose(out, ref, atol=2e-2, rtol=2e-2), err

    # Batch not a multiple of the tile: multi-step pipelined grid with a
    # ragged edge block and no host-side padding pass over x.
    B2 = 200
    x2 = jax.random.normal(jax.random.PRNGKey(1), (B2, INPUT_SIZE), jnp.float32)
    out2 = jax.block_until_ready(
        neural_network_forward(x2, w1_bf, b1_f, w2_p, b2_p, tile_b=64))
    ref2 = _reference(x2, w1, b1, w2, b2)
    assert out2.shape == (B2, OUTPUT_SIZE), out2.shape
    err2 = float(jnp.max(jnp.abs(out2 - ref2)))
    assert jnp.allclose(out2, ref2, atol=2e-2, rtol=2e-2), err2

    print("KERNEL_OK")
</pallas_src>

<mosaic_0001>
module attributes {stable_mosaic.version = 11 : i64} {
  func.func @mlp_kernel(%arg0: i32, %arg1: memref<8x3072xf32, #tpu.memory_space<vmem>>, %arg2: memref<3072x128xbf16, #tpu.memory_space<vmem>>, %arg3: memref<1x128xf32, #tpu.memory_space<vmem>>, %arg4: memref<128x128xbf16, #tpu.memory_space<vmem>>, %arg5: memref<1x128xbf16, #tpu.memory_space<vmem>>, %arg6: memref<8x128xbf16, #tpu.memory_space<vmem>>) attributes {dimension_semantics = [#tpu.dimension_semantics<parallel>], iteration_bounds = array<i64: 1>, scalar_prefetch = 0 : i64, scratch_operands = 0 : i64, tpu.core_type = #tpu.core_type<tc>, window_params = [{transform_indices = @transform_0, window_bounds = array<i64: 8, 3072>}, {pipeline_mode = #tpu.pipeline_mode<synchronous>, transform_indices = @transform_1, window_bounds = array<i64: 3072, 128>}, {pipeline_mode = #tpu.pipeline_mode<synchronous>, transform_indices = @transform_2, window_bounds = array<i64: 1, 128>}, {pipeline_mode = #tpu.pipeline_mode<synchronous>, transform_indices = @transform_3, window_bounds = array<i64: 128, 128>}, {pipeline_mode = #tpu.pipeline_mode<synchronous>, transform_indices = @transform_4, window_bounds = array<i64: 1, 128>}, {transform_indices = @transform_5, window_bounds = array<i64: 8, 128>}]} {
    %c0 = arith.constant 0 : index
    %c0_0 = arith.constant 0 : index
    %0 = vector.load %arg1[%c0, %c0_0] : memref<8x3072xf32, #tpu.memory_space<vmem>>, vector<8x3072xf32>
    %1 = arith.truncf %0 : vector<8x3072xf32> to vector<8x3072xbf16>
    %c0_1 = arith.constant 0 : index
    %c0_2 = arith.constant 0 : index
    %2 = vector.load %arg2[%c0_1, %c0_2] : memref<3072x128xbf16, #tpu.memory_space<vmem>>, vector<3072x128xbf16>
    %cst = arith.constant dense<0.000000e+00> : vector<8x128xf32>
    %3 = tpu.matmul %1, %2, %cst {dimension_numbers = #tpu.dot_dimension_numbers<[1], [0], [0], [1], [0, 0, 1, 1], [], []>} : vector<8x3072xbf16>, vector<3072x128xbf16>, vector<8x128xf32> -> vector<8x128xf32>
    %c0_3 = arith.constant 0 : index
    %c0_4 = arith.constant 0 : index
    %4 = vector.load %arg3[%c0_3, %c0_4] : memref<1x128xf32, #tpu.memory_space<vmem>>, vector<1x128xf32>
    %5 = vector.broadcast %4 : vector<1x128xf32> to vector<8x128xf32>
    %6 = arith.addf %3, %5 : vector<8x128xf32>
    %cst_5 = arith.constant 0.000000e+00 : f32
    %7 = vector.broadcast %cst_5 : f32 to vector<8x128xf32>
    %8 = arith.maximumf %6, %7 : vector<8x128xf32>
    %9 = arith.truncf %8 : vector<8x128xf32> to vector<8x128xbf16>
    %c0_6 = arith.constant 0 : index
    %c0_7 = arith.constant 0 : index
    %10 = vector.load %arg4[%c0_6, %c0_7] : memref<128x128xbf16, #tpu.memory_space<vmem>>, vector<128x128xbf16>
    %cst_8 = arith.constant dense<0.000000e+00> : vector<8x128xf32>
    %11 = tpu.matmul %9, %10, %cst_8 {dimension_numbers = #tpu.dot_dimension_numbers<[1], [0], [0], [1], [0, 0, 1, 1], [], []>} : vector<8x128xbf16>, vector<128x128xbf16>, vector<8x128xf32> -> vector<8x128xf32>
    %c0_9 = arith.constant 0 : index
    %c0_10 = arith.constant 0 : index
    %12 = vector.load %arg5[%c0_9, %c0_10] : memref<1x128xbf16, #tpu.memory_space<vmem>>, vector<1x128xbf16>
    %13 = arith.extf %12 : vector<1x128xbf16> to vector<1x128xf32>
    %14 = vector.broadcast %13 : vector<1x128xf32> to vector<8x128xf32>
    %15 = arith.addf %11, %14 : vector<8x128xf32>
    %16 = arith.truncf %15 : vector<8x128xf32> to vector<8x128xbf16>
    %c0_11 = arith.constant 0 : index
    %c0_12 = arith.constant 0 : index
    %17 = vector.load %arg6[%c0_11, %c0_12] : memref<8x128xbf16, #tpu.memory_space<vmem>>, vector<8x128xbf16>
    tpu.vector_store %arg6[%c0_11, %c0_12], %16 {strides = array<i32>} : memref<8x128xbf16, #tpu.memory_space<vmem>>, vector<8x128xbf16>,
    return
  }
  func.func @transform_0(%arg0: i32) -> (i32, i32) {
    %c0_i32 = arith.constant 0 : i32
    %c0_i32_0 = arith.constant 0 : i32
    return %arg0, %c0_i32 : i32, i32
  }
  func.func @transform_1(%arg0: i32) -> (i32, i32) {
    %c0_i32 = arith.constant 0 : i32
    %c0_i32_0 = arith.constant 0 : i32
    %c0_i32_1 = arith.constant 0 : i32
    return %c0_i32, %c0_i32_0 : i32, i32
  }
  func.func @transform_2(%arg0: i32) -> (i32, i32) {
    %c0_i32 = arith.constant 0 : i32
    %c0_i32_0 = arith.constant 0 : i32
    %c0_i32_1 = arith.constant 0 : i32
    return %c0_i32, %c0_i32_0 : i32, i32
  }
  func.func @transform_3(%arg0: i32) -> (i32, i32) {
    %c0_i32 = arith.constant 0 : i32
    %c0_i32_0 = arith.constant 0 : i32
    %c0_i32_1 = arith.constant 0 : i32
    return %c0_i32, %c0_i32_0 : i32, i32
  }
  func.func @transform_4(%arg0: i32) -> (i32, i32) {
    %c0_i32 = arith.constant 0 : i32
    %c0_i32_0 = arith.constant 0 : i32
    %c0_i32_1 = arith.constant 0 : i32
    return %c0_i32, %c0_i32_0 : i32, i32
  }
  func.func @transform_5(%arg0: i32) -> (i32, i32) {
    %c0_i32 = arith.constant 0 : i32
    %c0_i32_0 = arith.constant 0 : i32
    return %arg0, %c0_i32 : i32, i32
  }
}

</mosaic_0001>

<bundles_post_ra>
// kernel: neural_network_forward.1
= control target key start
LH: loop header
LB: loop body
LE: loop exit
PB: predicated region body
PF: predicated region fallthrough
CT: control target
= control target key end

     0   :  { %10 = vsyncpa [#allocation3], 0  ;;  %s3110_s0 = inlined_call_operand.hbm [shape: f32[8,3072], index: 0, kind: input, shape index: {}]   ;;  %s3111_s1 = inlined_call_operand.hbm [shape: bf16[3072,128], index: 1, kind: input, shape index: {}]   ;;  %s3112_s2 = inlined_call_operand.vmem [shape: f32[1,128], index: 2, kind: input, shape index: {}]   ;;  %s3113_s3 = inlined_call_operand.hbm [shape: bf16[128,128], index: 3, kind: input, shape index: {}]   ;;  %s3114_s4 = inlined_call_operand.vmem [shape: bf16[1,128], index: 4, kind: input, shape index: {}]   ;;  %s3115_s5 = inlined_call_operand.vmem [shape: bf16[8,128], index: 5, kind: output, shape index: {}]  }
   0x1   :  { %11 = vsyncpa [#allocation5], 0  ;;  %s3022_s18 = smov [#allocation4]   ;;  %s2952_s22 = scalar_lea.hbm %s3111_s1, 24576 }
   0x2   :  { %s27_s19 = sshll.u32 %s3022_s18, 4  ;;  %p2953_p0 = scmp.ne.s32.totalorder %s3111_s1, %s2952_s22  ;;  %s28_s19 = int_to_ptr.vmem [resolvable:$true] %s27_s19 }
   0x3   :  { %p2956_p1 = scmp.lt.u32.totalorder %s2952_s22, %s3111_s1 }
   0x5   :  { %p2958_p2 = pnand %p2956_p1, %p2953_p0 }
   0x7   :  { %2961 = shalt.err (!%p2958_p2)
}
   0x8   :  { %s2962_s27 = scalar_lea.vmem %s28_s19, 24576  ;;  %p2967_p4 = scmp.lt.s32.totalorder %s28_s19, %s28_s19 }
   0x9   :  { %p2963_p3 = scmp.ne.s32.totalorder %s28_s19, %s2962_s27  ;;  %p2968_p5 = scmp.lt.s32.totalorder %s2962_s27, %s2962_s27 }
   0xb   :  { %p2969_p6 = por %p2968_p5, %p2967_p4 }
   0xd   :  { %p2970_p7 = pnand %p2969_p6, %p2963_p3 }
   0xf   :  { %2973 = shalt.err (!%p2970_p7)
}
  0x10   :  { %s3023_s28 = smov 64   ;;  %s3024_s29 = smov 4  }
  0x11   :  { %33 = dma.hbm_to_vmem [thread:$0]  %s3111_s1, 24576, %s28_s19, [#allocation5], %s3023_s28, %s3023_s28, %s3024_s29  }
  0x12   :  { %s3025_s7 = smov [#allocation2]   ;;  %s3026_s9 = smov [#allocation6]  }
  0x13   :  { %s18_s8 = sshll.u32 %s3025_s7, 4  ;;  %s41_s10 = sshll.u32 %s3026_s9, 4  ;;  %s19_s8 = int_to_ptr.vmem [resolvable:$true] %s18_s8  ;;  %s42_s10 = int_to_ptr.vmem [resolvable:$true] %s41_s10 }
  0x14   :  { %s2974_s13 = scalar_lea.hbm %s3110_s0, 3072 }
  0x15   :  { %p2975_p8 = scmp.ne.s32.totalorder %s3110_s0, %s2974_s13  ;;  %p2978_p9 = scmp.lt.u32.totalorder %s2974_s13, %s3110_s0 }
  0x17   :  { %p2980_p10 = pnand %p2978_p9, %p2975_p8 }
  0x19   :  { %2983 = shalt.err (!%p2980_p10)
}
  0x1a   :  { %s2984_s1 = scalar_lea.vmem %s19_s8, 3072  ;;  %p2989_p12 = scmp.lt.s32.totalorder %s19_s8, %s19_s8 }
  0x1b   :  { %p2985_p11 = scmp.ne.s32.totalorder %s19_s8, %s2984_s1  ;;  %p2990_p13 = scmp.lt.s32.totalorder %s2984_s1, %s2984_s1 }
  0x1d   :  { %p2991_p0 = por %p2990_p13, %p2989_p12 }
  0x1f   :  { %p2992_p1 = pnand %p2991_p0, %p2985_p11 }
  0x21   :  { %2995 = shalt.err (!%p2992_p1)
}
  0x22   :  { %21 = dma.hbm_to_vmem [thread:$0]  %s3110_s0, 3072, %s19_s8, [#allocation3]  }
  0x23   :  { %s2996_s22 = scalar_lea.hbm %s3113_s3, 1024 }
  0x24   :  { %p2997_p2 = scmp.ne.s32.totalorder %s3113_s3, %s2996_s22  ;;  %p3000_p3 = scmp.lt.u32.totalorder %s2996_s22, %s3113_s3 }
  0x26   :  { %p3002_p4 = pnand %p3000_p3, %p2997_p2 }
  0x28   :  { %3005 = shalt.err (!%p3002_p4)
}
  0x29   :  { %s3006_s27 = scalar_lea.vmem %s42_s10, 1024  ;;  %p3011_p6 = scmp.lt.s32.totalorder %s42_s10, %s42_s10 }
  0x2a   :  { %p3007_p5 = scmp.ne.s32.totalorder %s42_s10, %s3006_s27  ;;  %p3012_p7 = scmp.lt.s32.totalorder %s3006_s27, %s3006_s27 }
  0x2c   :  { %p3013_p8 = por %p3012_p7, %p3011_p6 }
  0x2e   :  { %p3014_p9 = pnand %p3013_p8, %p3007_p5 }
  0x30   :  { %3017 = shalt.err (!%p3014_p9)
}
  0x31   :  { %47 = dma.hbm_to_vmem [thread:$0]  %s3113_s3, 1024, %s42_s10, [#allocation5], %s3023_s28, %s3023_s28, %s3024_s29  }
  0x32   :  { %3018 = dma.done.wait [#allocation3], 3072  }
  0x33   :  { %3019 = vsyncadd [#allocation3], 4294964224 }
  0x34   :  { %3020 = dma.done.wait [#allocation5], 25600  }
  0x35   :  { %3021 = vsyncadd [#allocation5], 4294941696  ;;  %v2752_v0 = vld [vmem:[#allocation4 + $0x40] sm:$0xff]   ;;  %v2756_v4 = vld [vmem:[#allocation4 + $0x48] sm:$0xff]   ;;  %vm3028_vm0 = vmmov 0  }
  0x36   :  { %v2753_v1 = vld [vmem:[#allocation4 + $0xc0] sm:$0xff]   ;;  %2452 = vmatprep.subr.bf16.mxu0 %v2752_v0  ;;  %v2757_v5 = vld [vmem:[#allocation4 + $0xc8] sm:$0xff]   ;;  %v2760_v8 = vld [vmem:[#allocation4 + $0x50] sm:$0xff]  }
  0x37   :  { %v2754_v2 = vld [vmem:[#allocation4] sm:$0xff]   ;;  %2474 = vmatprep.subr.bf16.mxu1 %v2753_v1  ;;  %v2758_v6 = vld [vmem:[#allocation4 + $0x8] sm:$0xff]   ;;  %v2761_v9 = vld [vmem:[#allocation4 + $0xd0] sm:$0xff]  }
  0x38   :  { %v2755_v3 = vld [vmem:[#allocation4 + $0x80] sm:$0xff]   ;;  %2453 = vmatpush3.bf16.msra.mxu0 %v2754_v2  ;;  %v2759_v7 = vld [vmem:[#allocation4 + $0x88] sm:$0xff]   ;;  %v2762_v10 = vld [vmem:[#allocation4 + $0x10] sm:$0xff]  }
  0x39   :  { %2475 = vmatpush3.bf16.msra.mxu1 %v2755_v3  ;;  %2454 = vmatprep.subr.bf16.mxu0 %v2756_v4  ;;  %v2763_v11 = vld [vmem:[#allocation4 + $0x90] sm:$0xff]   ;;  %v2764_v12 = vld [vmem:[#allocation4 + $0x58] sm:$0xff]   ;;  %v2768_v16 = vld [vmem:[#allocation4 + $0x60] sm:$0xff]  }
  0x3a   :  { %2476 = vmatprep.subr.bf16.mxu1 %v2757_v5  ;;  %v2765_v13 = vld [vmem:[#allocation4 + $0xd8] sm:$0xff]   ;;  %v2769_v17 = vld [vmem:[#allocation4 + $0xe0] sm:$0xff]   ;;  %v2772_v20 = vld [vmem:[#allocation4 + $0x68] sm:$0xff]  }
  0x3b   :  { %v2766_v14 = vld [vmem:[#allocation4 + $0x18] sm:$0xff]   ;;  %v2770_v18 = vld [vmem:[#allocation4 + $0x20] sm:$0xff]   ;;  %v2773_v21 = vld [vmem:[#allocation4 + $0xe8] sm:$0xff]  }
  0x3c   :  { %2455 = vmatpush3.bf16.msra.mxu0 %v2758_v6  ;;  %v2767_v15 = vld [vmem:[#allocation4 + $0x98] sm:$0xff]   ;;  %v2771_v19 = vld [vmem:[#allocation4 + $0xa0] sm:$0xff]   ;;  %v2774_v22 = vld [vmem:[#allocation4 + $0x28] sm:$0xff]  }
  0x3d   :  { %2477 = vmatpush3.bf16.msra.mxu1 %v2759_v7  ;;  %2456 = vmatprep.subr.bf16.mxu0 %v2760_v8  ;;  %v2775_v23 = vld [vmem:[#allocation4 + $0xa8] sm:$0xff]   ;;  %v2776_v24 = vld [vmem:[#allocation4 + $0x70] sm:$0xff]   ;;  %v2780_v28 = vld [vmem:[#allocation4 + $0x78] sm:$0xff]  }
  0x3e   :  { %2478 = vmatprep.subr.bf16.mxu1 %v2761_v9  ;;  %v2777_v25 = vld [vmem:[#allocation4 + $0xf0] sm:$0xff]   ;;  %v2781_v29 = vld [vmem:[#allocation4 + $0xf8] sm:$0xff]   ;;  %v61_v32 = vld [vmem:[#allocation2 + $0x8] sm:$0xff] }
  0x3f   :  { %v2778_v26 = vld [vmem:[#allocation4 + $0x30] sm:$0xff]   ;;  %v2782_v30 = vld [vmem:[#allocation4 + $0x38] sm:$0xff]   ;;  %v60_v34 = vld [vmem:[#allocation2] sm:$0xff]  ;;  %v85_v35 = vpack.c.bf16 %v61_v32, %v61_v32 }
  0x40   :  { %2457 = vmatpush3.bf16.msra.mxu0 %v2762_v10  ;;  %v2779_v27 = vld [vmem:[#allocation4 + $0xb0] sm:$0xff]   ;;  %v2783_v31 = vld [vmem:[#allocation4 + $0xb8] sm:$0xff]   ;;  %v84_v37 = vpack.c.bf16 %v60_v34, %v60_v34  ;;  %v2784_v40 = vld [vmem:[#allocation4 + $0x140] sm:$0xff]  }
  0x41   :  { %2479 = vmatpush3.bf16.msra.mxu1 %v2763_v11  ;;  %2458 = vmatprep.subr.bf16.mxu0 %v2764_v12  ;;  %v63_v33 = vld [vmem:[#allocation2 + $0x18] sm:$0xff]  ;;  %v62_v38 = vld [vmem:[#allocation2 + $0x10] sm:$0xff]  ;;  %v2785_v41 = vld [vmem:[#allocation4 + $0x1c0] sm:$0xff]  }
  0x42   :  { %2480 = vmatprep.subr.bf16.mxu1 %v2765_v13  ;;  %v87_v36 = vpack.c.bf16 %v63_v33, %v63_v33  ;;  %v86_v39 = vpack.c.bf16 %v62_v38, %v62_v38  ;;  %1683 = vmatprep.mubr.bf16.mxu0 %v85_v35  ;;  %v2786_v42 = vld [vmem:[#allocation4 + $0x100] sm:$0xff]   ;;  %v2788_v44 = vld [vmem:[#allocation4 + $0x148] sm:$0xff]   ;;  %v2792_v48 = vld [vmem:[#allocation4 + $0x150] sm:$0xff]  }
  0x43   :  { %v2787_v43 = vld [vmem:[#allocation4 + $0x180] sm:$0xff]   ;;  %v2789_v45 = vld [vmem:[#allocation4 + $0x1c8] sm:$0xff]   ;;  %v2793_v49 = vld [vmem:[#allocation4 + $0x1d0] sm:$0xff]  }
  0x44   :  { %2459 = vmatpush3.bf16.msra.mxu0 %v2766_v14  ;;  %1723 = vmatprep.mubr.bf16.mxu1 %v87_v36  ;;  %v2790_v46 = vld [vmem:[#allocation4 + $0x108] sm:$0xff]   ;;  %v2794_v50 = vld [vmem:[#allocation4 + $0x110] sm:$0xff]   ;;  %v2796_v52 = vld [vmem:[#allocation4 + $0x158] sm:$0xff]  }
  0x45   :  { %2481 = vmatpush3.bf16.msra.mxu1 %v2767_v15  ;;  %2460 = vmatprep.subr.bf16.mxu0 %v2768_v16  ;;  %v2791_v47 = vld [vmem:[#allocation4 + $0x188] sm:$0xff]   ;;  %v2795_v51 = vld [vmem:[#allocation4 + $0x190] sm:$0xff]   ;;  %v2797_v53 = vld [vmem:[#allocation4 + $0x1d8] sm:$0xff]  }
  0x46   :  { %2482 = vmatprep.subr.bf16.mxu1 %v2769_v17  ;;  %v2798_v54 = vld [vmem:[#allocation4 + $0x118] sm:$0xff]   ;;  %v2800_v56 = vld [vmem:[#allocation4 + $0x160] sm:$0xff]   ;;  %v2804_v60 = vld [vmem:[#allocation4 + $0x168] sm:$0xff]  }
  0x47   :  { %v2799_v55 = vld [vmem:[#allocation4 + $0x198] sm:$0xff]   ;;  %v2801_v57 = vld [vmem:[#allocation4 + $0x1e0] sm:$0xff]   ;;  %v2805_v61 = vld [vmem:[#allocation4 + $0x1e8] sm:$0xff]  }
  0x48   :  { %2461 = vmatpush3.bf16.msra.mxu0 %v2770_v18  ;;  %v2802_v58 = vld [vmem:[#allocation4 + $0x120] sm:$0xff]   ;;  %v2806_v62 = vld [vmem:[#allocation4 + $0x128] sm:$0xff]   ;;  %v2808_v0 = vld [vmem:[#allocation4 + $0x170] sm:$0xff]  }
  0x49   :  { %2483 = vmatpush3.bf16.msra.mxu1 %v2771_v19  ;;  %2462 = vmatprep.subr.bf16.mxu0 %v2772_v20  ;;  %v2803_v59 = vld [vmem:[#allocation4 + $0x1a0] sm:$0xff]   ;;  %v2807_v63 = vld [vmem:[#allocation4 + $0x1a8] sm:$0xff]   ;;  %v2809_v1 = vld [vmem:[#allocation4 + $0x1f0] sm:$0xff]  }
  0x4a   :  { %2484 = vmatprep.subr.bf16.mxu1 %v2773_v21  ;;  %v2810_v2 = vld [vmem:[#allocation4 + $0x130] sm:$0xff]   ;;  %v2812_v4 = vld [vmem:[#allocation4 + $0x178] sm:$0xff]   ;;  %v65_v8 = vld [vmem:[#allocation2 + $0x28] sm:$0xff] }
  0x4b   :  { %v2811_v3 = vld [vmem:[#allocation4 + $0x1b0] sm:$0xff]   ;;  %v2813_v5 = vld [vmem:[#allocation4 + $0x1f8] sm:$0xff]   ;;  %v89_v10 = vpack.c.bf16 %v65_v8, %v65_v8  ;;  %v64_v12 = vld [vmem:[#allocation2 + $0x20] sm:$0xff] }
  0x4c   :  { %2463 = vmatpush3.bf16.msra.mxu0 %v2774_v22  ;;  %v2814_v6 = vld [vmem:[#allocation4 + $0x138] sm:$0xff]   ;;  %v66_v13 = vld [vmem:[#allocation2 + $0x30] sm:$0xff]  ;;  %v88_v14 = vpack.c.bf16 %v64_v12, %v64_v12  ;;  %v2816_v16 = vld [vmem:[#allocation4 + $0x240] sm:$0xff]  }
  0x4d   :  { %2485 = vmatpush3.bf16.msra.mxu1 %v2775_v23  ;;  %2464 = vmatprep.subr.bf16.mxu0 %v2776_v24  ;;  %v2815_v7 = vld [vmem:[#allocation4 + $0x1b8] sm:$0xff]   ;;  %v90_v15 = vpack.c.bf16 %v66_v13, %v66_v13  ;;  %v2817_v17 = vld [vmem:[#allocation4 + $0x2c0] sm:$0xff]   ;;  %v2820_v20 = vld [vmem:[#allocation4 + $0x248] sm:$0xff]  }
  0x4e   :  { %2486 = vmatprep.subr.bf16.mxu1 %v2777_v25  ;;  %v67_v9 = vld [vmem:[#allocation2 + $0x38] sm:$0xff]  ;;  %v2818_v18 = vld [vmem:[#allocation4 + $0x200] sm:$0xff]   ;;  %v2821_v21 = vld [vmem:[#allocation4 + $0x2c8] sm:$0xff]  }
  0x4f   :  { %v91_v11 = vpack.c.bf16 %v67_v9, %v67_v9  ;;  %v2819_v19 = vld [vmem:[#allocation4 + $0x280] sm:$0xff]   ;;  %v2822_v22 = vld [vmem:[#allocation4 + $0x208] sm:$0xff]   ;;  %v2824_v24 = vld [vmem:[#allocation4 + $0x250] sm:$0xff]  }
  0x50   :  { %2465 = vmatpush3.bf16.msra.mxu0 %v2778_v26  ;;  %v2823_v23 = vld [vmem:[#allocation4 + $0x288] sm:$0xff]   ;;  %v2825_v25 = vld [vmem:[#allocation4 + $0x2d0] sm:$0xff]   ;;  %v2832_v32 = vld [vmem:[#allocation4 + $0x260] sm:$0xff]  }
  0x51   :  { %2487 = vmatpush3.bf16.msra.mxu1 %v2779_v27  ;;  %2466 = vmatprep.subr.bf16.mxu0 %v2780_v28  ;;  %v2826_v26 = vld [vmem:[#allocation4 + $0x210] sm:$0xff]   ;;  %v2828_v28 = vld [vmem:[#allocation4 + $0x258] sm:$0xff]   ;;  %v2833_v33 = vld [vmem:[#allocation4 + $0x2e0] sm:$0xff]  }
  0x52   :  { %2488 = vmatprep.subr.bf16.mxu1 %v2781_v29  ;;  %v2827_v27 = vld [vmem:[#allocation4 + $0x290] sm:$0xff]   ;;  %v2829_v29 = vld [vmem:[#allocation4 + $0x2d8] sm:$0xff]   ;;  %v2834_v34 = vld [vmem:[#allocation4 + $0x220] sm:$0xff]  }
  0x53   :  { %v2835_v35 = vld [vmem:[#allocation4 + $0x2a0] sm:$0xff]   ;;  %v2836_v36 = vld [vmem:[#allocation4 + $0x268] sm:$0xff]  }
  0x54   :  { %2467 = vmatpush3.bf16.msra.mxu0 %v2782_v30  ;;  %v2830_v30 = vld [vmem:[#allocation4 + $0x218] sm:$0xff]   ;;  %v2838_v38 = vld [vmem:[#allocation4 + $0x228] sm:$0xff]   ;;  %v2864_v8 = vld [vmem:[#allocation4 + $0x360] sm:$0xff]  }
  0x55   :  { %2489 = vmatpush3.bf16.msra.mxu1 %v2783_v31  ;;  %2496 = vmatprep.subr.bf16.mxu0 %v2784_v40  ;;  %v2831_v31 = vld [vmem:[#allocation4 + $0x298] sm:$0xff]   ;;  %v2840_v40 = vld [vmem:[#allocation4 + $0x270] sm:$0xff]   ;;  %v2865_v9 = vld [vmem:[#allocation4 + $0x3e0] sm:$0xff]  }
  0x56   :  { %2518 = vmatprep.subr.bf16.mxu1 %v2785_v41  ;;  %v2841_v41 = vld [vmem:[#allocation4 + $0x2f0] sm:$0xff]   ;;  %v2868_v12 = vld [vmem:[#allocation4 + $0x368] sm:$0xff]  }
  0x57   :  { %1684 = vmatmul.mubr.bf16.vlgmr.msra.gmra.mrb[0].mxu0 %v84_v37  ;;  %v2837_v37 = vld [vmem:[#allocation4 + $0x2e8] sm:$0xff]  }
  0x58   :  { %1724 = vmatmul.mubr.bf16.vlgmr.msra.gmra.mrb[0].mxu1 %v86_v39  ;;  %2497 = vmatpush3.bf16.msra.mxu0 %v2786_v42  ;;  %v2839_v39 = vld [vmem:[#allocation4 + $0x2a8] sm:$0xff]   ;;  %v2842_v42 = vld [vmem:[#allocation4 + $0x230] sm:$0xff]  }
  0x59   :  { %2519 = vmatpush3.bf16.msra.mxu1 %v2787_v43  ;;  %2498 = vmatprep.subr.bf16.mxu0 %v2788_v44  ;;  %v2843_v43 = vld [vmem:[#allocation4 + $0x2b0] sm:$0xff]   ;;  %v2844_v44 = vld [vmem:[#allocation4 + $0x278] sm:$0xff]   ;;  %v2869_v13 = vld [vmem:[#allocation4 + $0x3e8] sm:$0xff]  }
  0x5a   :  { %2520 = vmatprep.subr.bf16.mxu1 %v2789_v45  ;;  %1763 = vmatprep.mubr.bf16.mxu0 %v89_v10  ;;  %v2845_v45 = vld [vmem:[#allocation4 + $0x2f8] sm:$0xff]   ;;  %v2866_v10 = vld [vmem:[#allocation4 + $0x320] sm:$0xff]  }
  0x5b   :  { %1803 = vmatprep.mubr.bf16.mxu1 %v91_v11  ;;  %v2867_v11 = vld [vmem:[#allocation4 + $0x3a0] sm:$0xff]  }
  0x5c   :  { %2499 = vmatpush3.bf16.msra.mxu0 %v2790_v46  ;;  %v2846_v46 = vld [vmem:[#allocation4 + $0x238] sm:$0xff]  }
  0x5d   :  { %2521 = vmatpush3.bf16.msra.mxu1 %v2791_v47  ;;  %2500 = vmatprep.subr.bf16.mxu0 %v2792_v48  ;;  %v2847_v47 = vld [vmem:[#allocation4 + $0x2b8] sm:$0xff]   ;;  %v69_v48 = vld [vmem:[#allocation2 + $0x48] sm:$0xff] }
  0x5e   :  { %2522 = vmatprep.subr.bf16.mxu1 %v2793_v49  ;;  %v93_v49 = vpack.c.bf16 %v69_v48, %v69_v48  ;;  %v2896_v48 = vld [vmem:[#allocation4 + $0x460] sm:$0xff]  }
  0x60   :  { %2501 = vmatpush3.bf16.msra.mxu0 %v2794_v50  ;;  %v71_v50 = vld [vmem:[#allocation2 + $0x58] sm:$0xff] }
  0x61   :  { %2523 = vmatpush3.bf16.msra.mxu1 %v2795_v51  ;;  %2502 = vmatprep.subr.bf16.mxu0 %v2796_v52  ;;  %v68_v51 = vld [vmem:[#allocation2 + $0x40] sm:$0xff]  ;;  %v70_v52 = vld [vmem:[#allocation2 + $0x50] sm:$0xff] }
  0x62   :  { %2524 = vmatprep.subr.bf16.mxu1 %v2797_v53  ;;  %v95_v53 = vpack.c.bf16 %v71_v50, %v71_v50  ;;  %v2898_v50 = vld [vmem:[#allocation4 + $0x420] sm:$0xff]  }
  0x64   :  { %2503 = vmatpush3.bf16.msra.mxu0 %v2798_v54  ;;  %v92_v54 = vpack.c.bf16 %v68_v51, %v68_v51  ;;  %v2899_v51 = vld [vmem:[#allocation4 + $0x4a0] sm:$0xff]  }
  0x65   :  { %2525 = vmatpush3.bf16.msra.mxu1 %v2799_v55  ;;  %2504 = vmatprep.subr.bf16.mxu0 %v2800_v56  ;;  %v94_v55 = vpack.c.bf16 %v70_v52, %v70_v52  ;;  %v2848_v56 = vld [vmem:[#allocation4 + $0x340] sm:$0xff]   ;;  %v2900_v52 = vld [vmem:[#allocation4 + $0x468] sm:$0xff]  }
  0x66   :  { %2526 = vmatprep.subr.bf16.mxu1 %v2801_v57  ;;  %v2849_v57 = vld [vmem:[#allocation4 + $0x3c0] sm:$0xff]  }
  0x68   :  { %2505 = vmatpush3.bf16.msra.mxu0 %v2802_v58  ;;  %v2850_v58 = vld [vmem:[#allocation4 + $0x300] sm:$0xff]  }
  0x69   :  { %2527 = vmatpush3.bf16.msra.mxu1 %v2803_v59  ;;  %2506 = vmatprep.subr.bf16.mxu0 %v2804_v60  ;;  %v2851_v59 = vld [vmem:[#allocation4 + $0x380] sm:$0xff]   ;;  %v2852_v60 = vld [vmem:[#allocation4 + $0x348] sm:$0xff]  }
  0x6a   :  { %2528 = vmatprep.subr.bf16.mxu1 %v2805_v61  ;;  %v2853_v61 = vld [vmem:[#allocation4 + $0x3c8] sm:$0xff]  }
  0x6c   :  { %2507 = vmatpush3.bf16.msra.mxu0 %v2806_v62  ;;  %v2854_v62 = vld [vmem:[#allocation4 + $0x308] sm:$0xff]  }
  0x6d   :  { %2529 = vmatpush3.bf16.msra.mxu1 %v2807_v63  ;;  %2508 = vmatprep.subr.bf16.mxu0 %v2808_v0  ;;  %v2855_v63 = vld [vmem:[#allocation4 + $0x388] sm:$0xff]   ;;  %v2856_v0 = vld [vmem:[#allocation4 + $0x350] sm:$0xff]  }
  0x6e   :  { %2530 = vmatprep.subr.bf16.mxu1 %v2809_v1  ;;  %v2857_v1 = vld [vmem:[#allocation4 + $0x3d0] sm:$0xff]  }
  0x70   :  { %2509 = vmatpush3.bf16.msra.mxu0 %v2810_v2  ;;  %v2858_v2 = vld [vmem:[#allocation4 + $0x310] sm:$0xff]  }
  0x71   :  { %2531 = vmatpush3.bf16.msra.mxu1 %v2811_v3  ;;  %2510 = vmatprep.subr.bf16.mxu0 %v2812_v4  ;;  %v2859_v3 = vld [vmem:[#allocation4 + $0x390] sm:$0xff]   ;;  %v2860_v4 = vld [vmem:[#allocation4 + $0x358] sm:$0xff]  }
  0x72   :  { %2532 = vmatprep.subr.bf16.mxu1 %v2813_v5  ;;  %v2861_v5 = vld [vmem:[#allocation4 + $0x3d8] sm:$0xff]  }
  0x74   :  { %2511 = vmatpush3.bf16.msra.mxu0 %v2814_v6  ;;  %v2862_v6 = vld [vmem:[#allocation4 + $0x318] sm:$0xff]  }
  0x75   :  { %2533 = vmatpush3.bf16.msra.mxu1 %v2815_v7  ;;  %2540 = vmatprep.subr.bf16.mxu0 %v2816_v16  ;;  %v2863_v7 = vld [vmem:[#allocation4 + $0x398] sm:$0xff]   ;;  %v2872_v16 = vld [vmem:[#allocation4 + $0x370] sm:$0xff]  }
  0x76   :  { %2562 = vmatprep.subr.bf16.mxu1 %v2817_v17  ;;  %v2873_v17 = vld [vmem:[#allocation4 + $0x3f0] sm:$0xff]  }
  0x77   :  { %1764 = vmatmul.mubr.bf16.vlgmr.msra.gmra.mrb[4].mxu0 %v88_v14  ;;  %v2870_v14 = vld [vmem:[#allocation4 + $0x328] sm:$0xff]  }
  0x78   :  { %1804 = vmatmul.mubr.bf16.vlgmr.msra.gmra.mrb[4].mxu1 %v90_v15  ;;  %2541 = vmatpush3.bf16.msra.mxu0 %v2818_v18  ;;  %v2871_v15 = vld [vmem:[#allocation4 + $0x3a8] sm:$0xff]   ;;  %v2874_v18 = vld [vmem:[#allocation4 + $0x330] sm:$0xff]  }
  0x79   :  { %2563 = vmatpush3.bf16.msra.mxu1 %v2819_v19  ;;  %2542 = vmatprep.subr.bf16.mxu0 %v2820_v20  ;;  %v2875_v19 = vld [vmem:[#allocation4 + $0x3b0] sm:$0xff]   ;;  %v2876_v20 = vld [vmem:[#allocation4 + $0x378] sm:$0xff]  }
  0x7a   :  { %2564 = vmatprep.subr.bf16.mxu1 %v2821_v21  ;;  %1843 = vmatprep.mubr.bf16.mxu0 %v93_v49  ;;  %v2877_v21 = vld [vmem:[#allocation4 + $0x3f8] sm:$0xff]   ;;  %v2897_v49 = vld [vmem:[#allocation4 + $0x4e0] sm:$0xff]  }
  0x7b   :  { %1883 = vmatprep.mubr.bf16.mxu1 %v95_v53  ;;  %v2901_v53 = vld [vmem:[#allocation4 + $0x4e8] sm:$0xff]  }
  0x7c   :  { %2543 = vmatpush3.bf16.msra.mxu0 %v2822_v22  ;;  %v2878_v22 = vld [vmem:[#allocation4 + $0x338] sm:$0xff]  }
  0x7d   :  { %2565 = vmatpush3.bf16.msra.mxu1 %v2823_v23  ;;  %2544 = vmatprep.subr.bf16.mxu0 %v2824_v24  ;;  %v2879_v23 = vld [vmem:[#allocation4 + $0x3b8] sm:$0xff]   ;;  %v73_v24 = vld [vmem:[#allocation2 + $0x68] sm:$0xff] }
  0x7e   :  { %2566 = vmatprep.subr.bf16.mxu1 %v2825_v25  ;;  %v75_v25 = vld [vmem:[#allocation2 + $0x78] sm:$0xff] }
  0x80   :  { %2545 = vmatpush3.bf16.msra.mxu0 %v2826_v26  ;;  %v72_v26 = vld [vmem:[#allocation2 + $0x60] sm:$0xff] }
  0x81   :  { %2567 = vmatpush3.bf16.msra.mxu1 %v2827_v27  ;;  %2546 = vmatprep.subr.bf16.mxu0 %v2828_v28  ;;  %v97_v27 = vpack.c.bf16 %v73_v24, %v73_v24  ;;  %v99_v28 = vpack.c.bf16 %v75_v25, %v75_v25  ;;  %v2928_v24 = vld [vmem:[#allocation4 + $0x560] sm:$0xff]  }
  0x82   :  { %2568 = vmatprep.subr.bf16.mxu1 %v2829_v29  ;;  %v96_v29 = vpack.c.bf16 %v72_v26, %v72_v26  ;;  %v2929_v25 = vld [vmem:[#allocation4 + $0x5e0] sm:$0xff]  }
  0x83   :  { %v2930_v26 = vld [vmem:[#allocation4 + $0x520] sm:$0xff]  }
  0x84   :  { %2547 = vmatpush3.bf16.msra.mxu0 %v2830_v30  ;;  %v74_v30 = vld [vmem:[#allocation2 + $0x70] sm:$0xff] }
  0x85   :  { %2569 = vmatpush3.bf16.msra.mxu1 %v2831_v31  ;;  %2548 = vmatprep.subr.bf16.mxu0 %v2832_v32  ;;  %v98_v31 = vpack.c.bf16 %v74_v30, %v74_v30  ;;  %v2880_v32 = vld [vmem:[#allocation4 + $0x440] sm:$0xff]   ;;  %v2934_v30 = vld [vmem:[#allocation4 + $0x528] sm:$0xff]  }
  0x86   :  { %2570 = vmatprep.subr.bf16.mxu1 %v2833_v33  ;;  %v2881_v33 = vld [vmem:[#allocation4 + $0x4c0] sm:$0xff]  }
  0x88   :  { %2549 = vmatpush3.bf16.msra.mxu0 %v2834_v34  ;;  %v2882_v34 = vld [vmem:[#allocation4 + $0x400] sm:$0xff]  }
  0x89   :  { %2571 = vmatpush3.bf16.msra.mxu1 %v2835_v35  ;;  %2550 = vmatprep.subr.bf16.mxu0 %v2836_v36  ;;  %v2883_v35 = vld [vmem:[#allocation4 + $0x480] sm:$0xff]   ;;  %v2884_v36 = vld [vmem:[#allocation4 + $0x448] sm:$0xff]  }
  0x8a   :  { %2572 = vmatprep.subr.bf16.mxu1 %v2837_v37  ;;  %v2885_v37 = vld [vmem:[#allocation4 + $0x4c8] sm:$0xff]  }
  0x8c   :  { %2551 = vmatpush3.bf16.msra.mxu0 %v2838_v38  ;;  %v2886_v38 = vld [vmem:[#allocation4 + $0x408] sm:$0xff]  }
  0x8d   :  { %2573 = vmatpush3.bf16.msra.mxu1 %v2839_v39  ;;  %2552 = vmatprep.subr.bf16.mxu0 %v2840_v40  ;;  %v2887_v39 = vld [vmem:[#allocation4 + $0x488] sm:$0xff]   ;;  %v2888_v40 = vld [vmem:[#allocation4 + $0x450] sm:$0xff]  }
  0x8e   :  { %2574 = vmatprep.subr.bf16.mxu1 %v2841_v41  ;;  %v2889_v41 = vld [vmem:[#allocation4 + $0x4d0] sm:$0xff]  }
  0x90   :  { %2553 = vmatpush3.bf16.msra.mxu0 %v2842_v42  ;;  %v2890_v42 = vld [vmem:[#allocation4 + $0x410] sm:$0xff]  }
  0x91   :  { %2575 = vmatpush3.bf16.msra.mxu1 %v2843_v43  ;;  %2554 = vmatprep.subr.bf16.mxu0 %v2844_v44  ;;  %v2891_v43 = vld [vmem:[#allocation4 + $0x490] sm:$0xff]   ;;  %v2892_v44 = vld [vmem:[#allocation4 + $0x458] sm:$0xff]  }
  0x92   :  { %2576 = vmatprep.subr.bf16.mxu1 %v2845_v45  ;;  %v2893_v45 = vld [vmem:[#allocation4 + $0x4d8] sm:$0xff]  }
  0x94   :  { %2555 = vmatpush3.bf16.msra.mxu0 %v2846_v46  ;;  %v2894_v46 = vld [vmem:[#allocation4 + $0x418] sm:$0xff]  }
  0x95   :  { %2577 = vmatpush3.bf16.msra.mxu1 %v2847_v47  ;;  %2584 = vmatprep.subr.bf16.mxu0 %v2848_v56  ;;  %v2895_v47 = vld [vmem:[#allocation4 + $0x498] sm:$0xff]   ;;  %v2904_v56 = vld [vmem:[#allocation4 + $0x470] sm:$0xff]  }
  0x96   :  { %2606 = vmatprep.subr.bf16.mxu1 %v2849_v57  ;;  %v2905_v57 = vld [vmem:[#allocation4 + $0x4f0] sm:$0xff]  }
  0x97   :  { %1844 = vmatmul.mubr.bf16.vlgmr.msra.gmra.mrb[8].mxu0 %v92_v54  ;;  %v2902_v54 = vld [vmem:[#allocation4 + $0x428] sm:$0xff]  }
  0x98   :  { %1884 = vmatmul.mubr.bf16.vlgmr.msra.gmra.mrb[8].mxu1 %v94_v55  ;;  %2585 = vmatpush3.bf16.msra.mxu0 %v2850_v58  ;;  %v2903_v55 = vld [vmem:[#allocation4 + $0x4a8] sm:$0xff]   ;;  %v2906_v58 = vld [vmem:[#allocation4 + $0x430] sm:$0xff]  }
  0x99   :  { %2607 = vmatpush3.bf16.msra.mxu1 %v2851_v59  ;;  %2586 = vmatprep.subr.bf16.mxu0 %v2852_v60  ;;  %v2907_v59 = vld [vmem:[#allocation4 + $0x4b0] sm:$0xff]   ;;  %v2908_v60 = vld [vmem:[#allocation4 + $0x478] sm:$0xff]  }
  0x9a   :  { %2608 = vmatprep.subr.bf16.mxu1 %v2853_v61  ;;  %1923 = vmatprep.mubr.bf16.mxu0 %v97_v27  ;;  %v2909_v61 = vld [vmem:[#allocation4 + $0x4f8] sm:$0xff]   ;;  %v2931_v27 = vld [vmem:[#allocation4 + $0x5a0] sm:$0xff]  }
  0x9b   :  { %1963 = vmatprep.mubr.bf16.mxu1 %v99_v28  ;;  %v2932_v28 = vld [vmem:[#allocation4 + $0x568] sm:$0xff]  }
  0x9c   :  { %2587 = vmatpush3.bf16.msra.mxu0 %v2854_v62  ;;  %v2910_v62 = vld [vmem:[#allocation4 + $0x438] sm:$0xff]  }
  0x9d   :  { %2609 = vmatpush3.bf16.msra.mxu1 %v2855_v63  ;;  %2588 = vmatprep.subr.bf16.mxu0 %v2856_v0  ;;  %v2911_v63 = vld [vmem:[#allocation4 + $0x4b8] sm:$0xff]   ;;  %v77_v0 = vld [vmem:[#allocation2 + $0x88] sm:$0xff] }
  0x9e   :  { %2610 = vmatprep.subr.bf16.mxu1 %v2857_v1  ;;  %v79_v1 = vld [vmem:[#allocation2 + $0x98] sm:$0xff] }
  0xa0   :  { %2589 = vmatpush3.bf16.msra.mxu0 %v2858_v2  ;;  %v101_v2 = vpack.c.bf16 %v77_v0, %v77_v0  ;;  %v2946_v0 = vld [vmem:[#allocation6 + $0x10] sm:$0xff]  }
  0xa1   :  { %2611 = vmatpush3.bf16.msra.mxu1 %v2859_v3  ;;  %2590 = vmatprep.subr.bf16.mxu0 %v2860_v4  ;;  %v103_v3 = vpack.c.bf16 %v79_v1, %v79_v1  ;;  %v76_v4 = vld [vmem:[#allocation2 + $0x80] sm:$0xff]  ;;  %v2947_v1 = vld [vmem:[#allocation6 + $0x18] sm:$0xff]  }
  0xa2   :  { %2612 = vmatprep.subr.bf16.mxu1 %v2861_v5  ;;  %v78_v5 = vld [vmem:[#allocation2 + $0x90] sm:$0xff] }
  0xa4   :  { %2591 = vmatpush3.bf16.msra.mxu0 %v2862_v6  ;;  %v100_v6 = vpack.c.bf16 %v76_v4, %v76_v4 }
  0xa5   :  { %2613 = vmatpush3.bf16.msra.mxu1 %v2863_v7  ;;  %2592 = vmatprep.subr.bf16.mxu0 %v2864_v8  ;;  %v102_v7 = vpack.c.bf16 %v78_v5, %v78_v5  ;;  %v2912_v8 = vld [vmem:[#allocation4 + $0x540] sm:$0xff]  }
  0xa6   :  { %2614 = vmatprep.subr.bf16.mxu1 %v2865_v9  ;;  %v2913_v9 = vld [vmem:[#allocation4 + $0x5c0] sm:$0xff]  }
  0xa8   :  { %2593 = vmatpush3.bf16.msra.mxu0 %v2866_v10  ;;  %v2914_v10 = vld [vmem:[#allocation4 + $0x500] sm:$0xff]  }
  0xa9   :  { %2615 = vmatpush3.bf16.msra.mxu1 %v2867_v11  ;;  %2594 = vmatprep.subr.bf16.mxu0 %v2868_v12  ;;  %v2915_v11 = vld [vmem:[#allocation4 + $0x580] sm:$0xff]   ;;  %v2916_v12 = vld [vmem:[#allocation4 + $0x548] sm:$0xff]  }
  0xaa   :  { %2616 = vmatprep.subr.bf16.mxu1 %v2869_v13  ;;  %v2917_v13 = vld [vmem:[#allocation4 + $0x5c8] sm:$0xff]  }
  0xac   :  { %2595 = vmatpush3.bf16.msra.mxu0 %v2870_v14  ;;  %v2918_v14 = vld [vmem:[#allocation4 + $0x508] sm:$0xff]  }
  0xad   :  { %2617 = vmatpush3.bf16.msra.mxu1 %v2871_v15  ;;  %2596 = vmatprep.subr.bf16.mxu0 %v2872_v16  ;;  %v2919_v15 = vld [vmem:[#allocation4 + $0x588] sm:$0xff]   ;;  %v2920_v16 = vld [vmem:[#allocation4 + $0x550] sm:$0xff]  }
  0xae   :  { %2618 = vmatprep.subr.bf16.mxu1 %v2873_v17  ;;  %v2921_v17 = vld [vmem:[#allocation4 + $0x5d0] sm:$0xff]  }
  0xb0   :  { %2597 = vmatpush3.bf16.msra.mxu0 %v2874_v18  ;;  %v2922_v18 = vld [vmem:[#allocation4 + $0x510] sm:$0xff]  }
  0xb1   :  { %2619 = vmatpush3.bf16.msra.mxu1 %v2875_v19  ;;  %2598 = vmatprep.subr.bf16.mxu0 %v2876_v20  ;;  %v2923_v19 = vld [vmem:[#allocation4 + $0x590] sm:$0xff]   ;;  %v2924_v20 = vld [vmem:[#allocation4 + $0x558] sm:$0xff]  }
  0xb2   :  { %2620 = vmatprep.subr.bf16.mxu1 %v2877_v21  ;;  %v2925_v21 = vld [vmem:[#allocation4 + $0x5d8] sm:$0xff]  }
  0xb4   :  { %2599 = vmatpush3.bf16.msra.mxu0 %v2878_v22  ;;  %v2926_v22 = vld [vmem:[#allocation4 + $0x518] sm:$0xff]  }
  0xb5   :  { %2621 = vmatpush3.bf16.msra.mxu1 %v2879_v23  ;;  %2628 = vmatprep.subr.bf16.mxu0 %v2880_v32  ;;  %v2927_v23 = vld [vmem:[#allocation4 + $0x598] sm:$0xff]   ;;  %v2936_v32 = vld [vmem:[#allocation4 + $0x570] sm:$0xff]  }
  0xb6   :  { %2650 = vmatprep.subr.bf16.mxu1 %v2881_v33  ;;  %v2937_v33 = vld [vmem:[#allocation4 + $0x5f0] sm:$0xff]  }
  0xb7   :  { %1924 = vmatmul.mubr.bf16.vlgmr.msra.gmra.mrb[12].mxu0 %v96_v29  ;;  %v2933_v29 = vld [vmem:[#allocation4 + $0x5e8] sm:$0xff]  }
  0xb8   :  { %1964 = vmatmul.mubr.bf16.vlgmr.msra.gmra.mrb[12].mxu1 %v98_v31  ;;  %2629 = vmatpush3.bf16.msra.mxu0 %v2882_v34  ;;  %v2935_v31 = vld [vmem:[#allocation4 + $0x5a8] sm:$0xff]   ;;  %v2938_v34 = vld [vmem:[#allocation4 + $0x530] sm:$0xff]  }
  0xb9   :  { %2651 = vmatpush3.bf16.msra.mxu1 %v2883_v35  ;;  %2630 = vmatprep.subr.bf16.mxu0 %v2884_v36  ;;  %v2939_v35 = vld [vmem:[#allocation4 + $0x5b0] sm:$0xff]   ;;  %v2940_v36 = vld [vmem:[#allocation4 + $0x578] sm:$0xff]  }
  0xba   :  { %2652 = vmatprep.subr.bf16.mxu1 %v2885_v37  ;;  %2003 = vmatprep.mubr.bf16.mxu0 %v101_v2  ;;  %v2941_v37 = vld [vmem:[#allocation4 + $0x5f8] sm:$0xff]   ;;  %v2948_v2 = vld [vmem:[#allocation6 + $0x20] sm:$0xff]  }
  0xbb   :  { %2043 = vmatprep.mubr.bf16.mxu1 %v103_v3 }
  0xbc   :  { %2631 = vmatpush3.bf16.msra.mxu0 %v2886_v38  ;;  %v2942_v38 = vld [vmem:[#allocation4 + $0x538] sm:$0xff]  }
  0xbd   :  { %2653 = vmatpush3.bf16.msra.mxu1 %v2887_v39  ;;  %2632 = vmatprep.subr.bf16.mxu0 %v2888_v40  ;;  %v2943_v39 = vld [vmem:[#allocation4 + $0x5b8] sm:$0xff]   ;;  %v81_v40 = vld [vmem:[#allocation2 + $0xa8] sm:$0xff] }
  0xbe   :  { %2654 = vmatprep.subr.bf16.mxu1 %v2889_v41  ;;  %v105_v41 = vpack.c.bf16 %v81_v40, %v81_v40 }
  0xc0   :  { %2633 = vmatpush3.bf16.msra.mxu0 %v2890_v42  ;;  %v83_v42 = vld [vmem:[#allocation2 + $0xb8] sm:$0xff] }
  0xc1   :  { %2655 = vmatpush3.bf16.msra.mxu1 %v2891_v43  ;;  %2634 = vmatprep.subr.bf16.mxu0 %v2892_v44  ;;  %v80_v43 = vld [vmem:[#allocation2 + $0xa0] sm:$0xff]  ;;  %v82_v44 = vld [vmem:[#allocation2 + $0xb0] sm:$0xff] }
  0xc2   :  { %2656 = vmatprep.subr.bf16.mxu1 %v2893_v45  ;;  %v107_v45 = vpack.c.bf16 %v83_v42, %v83_v42 }
  0xc4   :  { %2635 = vmatpush3.bf16.msra.mxu0 %v2894_v46  ;;  %v104_v46 = vpack.c.bf16 %v80_v43, %v80_v43 }
  0xc5   :  { %2657 = vmatpush3.bf16.msra.mxu1 %v2895_v47  ;;  %2636 = vmatprep.subr.bf16.mxu0 %v2896_v48  ;;  %v106_v47 = vpack.c.bf16 %v82_v44, %v82_v44 }
  0xc6   :  { %2658 = vmatprep.subr.bf16.mxu1 %v2897_v49 }
  0xc8   :  { %2637 = vmatpush3.bf16.msra.mxu0 %v2898_v50  ;;  %v2251_v50 = vld [vmem:[%s3112_s2] ss:$0 sm:$0xff] }
  0xc9   :  { %2659 = vmatpush3.bf16.msra.mxu1 %v2899_v51  ;;  %2638 = vmatprep.subr.bf16.mxu0 %v2900_v52 }
  0xca   :  { %2660 = vmatprep.subr.bf16.mxu1 %v2901_v53 }
  0xcc   :  { %2639 = vmatpush3.bf16.msra.mxu0 %v2902_v54 }
  0xcd   :  { %2661 = vmatpush3.bf16.msra.mxu1 %v2903_v55  ;;  %2640 = vmatprep.subr.bf16.mxu0 %v2904_v56 }
  0xce   :  { %2662 = vmatprep.subr.bf16.mxu1 %v2905_v57 }
  0xd0   :  { %2641 = vmatpush3.bf16.msra.mxu0 %v2906_v58 }
  0xd1   :  { %2663 = vmatpush3.bf16.msra.mxu1 %v2907_v59  ;;  %2642 = vmatprep.subr.bf16.mxu0 %v2908_v60 }
  0xd2   :  { %2664 = vmatprep.subr.bf16.mxu1 %v2909_v61  ;;  %v2944_v61 = vld [vmem:[#allocation6] sm:$0xff]  }
  0xd4   :  { %2643 = vmatpush3.bf16.msra.mxu0 %v2910_v62  ;;  %v3027_v62 = vmov 0.0  }
  0xd5   :  { %2665 = vmatpush3.bf16.msra.mxu1 %v2911_v63  ;;  %2672 = vmatprep.subr.bf16.mxu0 %v2912_v8  ;;  %v2945_v63 = vld [vmem:[#allocation6 + $0x8] sm:$0xff]  }
  0xd6   :  { %2694 = vmatprep.subr.bf16.mxu1 %v2913_v9 }
  0xd7   :  { %2004 = vmatmul.mubr.bf16.vlgmr.msra.gmra.mrb[16].mxu0 %v100_v6 }
  0xd8   :  { %2044 = vmatmul.mubr.bf16.vlgmr.msra.gmra.mrb[16].mxu1 %v102_v7  ;;  %2673 = vmatpush3.bf16.msra.mxu0 %v2914_v10 }
  0xd9   :  { %2695 = vmatpush3.bf16.msra.mxu1 %v2915_v11  ;;  %2674 = vmatprep.subr.bf16.mxu0 %v2916_v12 }
  0xda   :  { %2696 = vmatprep.subr.bf16.mxu1 %v2917_v13  ;;  %2083 = vmatprep.mubr.bf16.mxu0 %v105_v41 }
  0xdb   :  { %2123 = vmatprep.mubr.bf16.mxu1 %v107_v45 }
  0xdc   :  { %2675 = vmatpush3.bf16.msra.mxu0 %v2918_v14  ;;  %v2949_v14 = vld [vmem:[#allocation6 + $0x28] sm:$0xff]  }
  0xdd   :  { %2697 = vmatpush3.bf16.msra.mxu1 %v2919_v15  ;;  %2676 = vmatprep.subr.bf16.mxu0 %v2920_v16  ;;  %v2950_v16 = vld [vmem:[#allocation6 + $0x30] sm:$0xff]  }
  0xde   :  { %2698 = vmatprep.subr.bf16.mxu1 %v2921_v17  ;;  %v2951_v17 = vld [vmem:[#allocation6 + $0x38] sm:$0xff]  }
  0xe0   :  { %2677 = vmatpush3.bf16.msra.mxu0 %v2922_v18 }
  0xe1   :  { %2699 = vmatpush3.bf16.msra.mxu1 %v2923_v19  ;;  %2678 = vmatprep.subr.bf16.mxu0 %v2924_v20 }
  0xe2   :  { %2700 = vmatprep.subr.bf16.mxu1 %v2925_v21 }
  0xe4   :  { %2679 = vmatpush3.bf16.msra.mxu0 %v2926_v22 }
  0xe5   :  { %2701 = vmatpush3.bf16.msra.mxu1 %v2927_v23  ;;  %2680 = vmatprep.subr.bf16.mxu0 %v2928_v24 }
  0xe6   :  { %2702 = vmatprep.subr.bf16.mxu1 %v2929_v25 }
  0xe8   :  { %2681 = vmatpush3.bf16.msra.mxu0 %v2930_v26 }
  0xe9   :  { %2703 = vmatpush3.bf16.msra.mxu1 %v2931_v27  ;;  %2682 = vmatprep.subr.bf16.mxu0 %v2932_v28 }
  0xea   :  { %2704 = vmatprep.subr.bf16.mxu1 %v2933_v29 }
  0xec   :  { %2683 = vmatpush3.bf16.msra.mxu0 %v2934_v30 }
  0xed   :  { %2705 = vmatpush3.bf16.msra.mxu1 %v2935_v31  ;;  %2684 = vmatprep.subr.bf16.mxu0 %v2936_v32 }
  0xee   :  { %2706 = vmatprep.subr.bf16.mxu1 %v2937_v33 }
  0xf0   :  { %2685 = vmatpush3.bf16.msra.mxu0 %v2938_v34 }
  0xf1   :  { %2707 = vmatpush3.bf16.msra.mxu1 %v2939_v35  ;;  %2686 = vmatprep.subr.bf16.mxu0 %v2940_v36 }
  0xf2   :  { %2708 = vmatprep.subr.bf16.mxu1 %v2941_v37 }
  0xf4   :  { %2687 = vmatpush3.bf16.msra.mxu0 %v2942_v38 }
  0xf5   :  { %2709 = vmatpush3.bf16.msra.mxu1 %v2943_v39  ;;  %2725 = vmatprep.subr.bf16.mxu0 %v3027_v62 }
  0xf7   :  { %2084 = vmatmul.mubr.bf16.vlgmr.msra.gmra.mrb[20].mxu0 %v104_v46 }
  0xf8   :  { %2124 = vmatmul.mubr.bf16.vlgmr.msra.gmra.mrb[20].mxu1 %v106_v47  ;;  %2726 = vmatpush3.bf16.msra.mxu0 %v2944_v61 }
  0xf9   :  { %2727 = vmatprep.subr.bf16.mxu0 %v3027_v62  ;;  %2741 = vmatprep.mubr.msk.bf16.mxu0 %vm3028_vm0, %v3027_v62 }
  0xfc   :  { %2728 = vmatpush3.bf16.msra.mxu0 %v2945_v63 }
  0xfd   :  { %2729 = vmatprep.subr.bf16.mxu0 %v3027_v62 }
 0x100   :  { %2730 = vmatpush3.bf16.msra.mxu0 %v2946_v0 }
 0x101   :  { %2731 = vmatprep.subr.bf16.mxu0 %v3027_v62 }
 0x104   :  { %2732 = vmatpush3.bf16.msra.mxu0 %v2947_v1 }
 0x105   :  { %2733 = vmatprep.subr.bf16.mxu0 %v3027_v62 }
 0x108   :  { %2734 = vmatpush3.bf16.msra.mxu0 %v2948_v2 }
 0x109   :  { %2735 = vmatprep.subr.bf16.mxu0 %v3027_v62 }
 0x10c   :  { %2736 = vmatpush3.bf16.msra.mxu0 %v2949_v14 }
 0x10d   :  { %2737 = vmatprep.subr.bf16.mxu0 %v3027_v62 }
 0x110   :  { %2738 = vmatpush3.bf16.msra.mxu0 %v2950_v16 }
 0x111   :  { %2739 = vmatprep.subr.bf16.mxu0 %v3027_v62 }
 0x114   :  { %2740 = vmatpush3.bf16.msra.mxu0 %v2951_v17 }
 0x12a   :  { %v2468_v48 = vpop.f32.mrb[0].mxu0 }
 0x12b   :  { %v2490_v49 = vpop.f32.mrb[0].mxu1  ;;  %v2469_v51 = vpop.f32.mrb[1].mxu0 }
 0x12c   :  { %v2491_v52 = vpop.f32.mrb[1].mxu1  ;;  %v2470_v53 = vadd.f32 %v2469_v51, %v2468_v48  ;;  %v2471_v55 = vpop.f32.mrb[2].mxu0 }
 0x12d   :  { %v2492_v54 = vadd.f32 %v2491_v52, %v2490_v49  ;;  %v2493_v56 = vpop.f32.mrb[2].mxu1  ;;  %v2472_v57 = vpop.f32.mrb[3].mxu0 }
 0x12e   :  { %v2494_v58 = vpop.f32.mrb[3].mxu1  ;;  %v1686_v59 = vadd.f32 %v2470_v53, %v2251_v50 }
 0x130   :  { %v1726_v60 = vadd.f32 %v2492_v54, %v1686_v59 }
 0x14a   :  { %v2512_v3 = vpop.f32.mrb[4].mxu0 }
 0x14b   :  { %v2534_v4 = vpop.f32.mrb[4].mxu1  ;;  %v2513_v5 = vpop.f32.mrb[5].mxu0 }
 0x14c   :  { %v2514_v6 = vadd.f32 %v2513_v5, %v2512_v3  ;;  %v2535_v7 = vpop.f32.mrb[5].mxu1  ;;  %v2515_v8 = vpop.f32.mrb[6].mxu0 }
 0x14d   :  { %v2536_v9 = vadd.f32 %v2535_v7, %v2534_v4  ;;  %v2537_v10 = vpop.f32.mrb[6].mxu1  ;;  %v2516_v11 = vpop.f32.mrb[7].mxu0  ;;  %v2151_v4 = vlaneseq }
 0x14e   :  { %v1766_v12 = vadd.f32 %v2514_v6, %v1726_v60  ;;  %v2538_v13 = vpop.f32.mrb[7].mxu1  ;;  %v2149_v6 = vld [vmem:[%s3114_s4] sm:$0x1] }
 0x14f   :  { %v2152_v5 = vshrl.u32 %v2151_v4, 7  ;;  %v2150_v7 = vunpack.c.l.bf16 %v2149_v6 }
 0x150   :  { %v1806_v15 = vadd.f32 %v2536_v9, %v1766_v12 }
 0x151   :  { %v2153_v8 = vsub.s32 0, %v2152_v5 }
 0x153   :  { %v2154_v9 = vrot.slane %v2150_v7, %v2153_v8 }
 0x16a   :  { %v2556_v18 = vpop.f32.mrb[8].mxu0 }
 0x16b   :  { %v2578_v19 = vpop.f32.mrb[8].mxu1  ;;  %v2557_v20 = vpop.f32.mrb[9].mxu0 }
 0x16c   :  { %v2558_v21 = vadd.f32 %v2557_v20, %v2556_v18  ;;  %v2579_v22 = vpop.f32.mrb[9].mxu1  ;;  %v2559_v23 = vpop.f32.mrb[10].mxu0 }
 0x16d   :  { %v2580_v24 = vadd.f32 %v2579_v22, %v2578_v19  ;;  %v2581_v25 = vpop.f32.mrb[10].mxu1  ;;  %v2560_v26 = vpop.f32.mrb[11].mxu0 }
 0x16e   :  { %v1846_v27 = vadd.f32 %v2558_v21, %v1806_v15  ;;  %v2582_v28 = vpop.f32.mrb[11].mxu1 }
 0x170   :  { %v1886_v29 = vadd.f32 %v2580_v24, %v1846_v27 }
 0x18a   :  { %v2600_v30 = vpop.f32.mrb[12].mxu0 }
 0x18b   :  { %v2622_v31 = vpop.f32.mrb[12].mxu1  ;;  %v2601_v32 = vpop.f32.mrb[13].mxu0 }
 0x18c   :  { %v2623_v33 = vpop.f32.mrb[13].mxu1  ;;  %v2602_v34 = vadd.f32 %v2601_v32, %v2600_v30  ;;  %v2603_v36 = vpop.f32.mrb[14].mxu0 }
 0x18d   :  { %v2624_v35 = vadd.f32 %v2623_v33, %v2622_v31  ;;  %v2625_v37 = vpop.f32.mrb[14].mxu1  ;;  %v2604_v38 = vpop.f32.mrb[15].mxu0 }
 0x18e   :  { %v2626_v39 = vpop.f32.mrb[15].mxu1  ;;  %v1926_v40 = vadd.f32 %v2602_v34, %v1886_v29 }
 0x190   :  { %v1966_v41 = vadd.f32 %v2624_v35, %v1926_v40 }
 0x1aa   :  { %v2644_v42 = vpop.f32.mrb[16].mxu0 }
 0x1ab   :  { %v2666_v43 = vpop.f32.mrb[16].mxu1  ;;  %v2645_v44 = vpop.f32.mrb[17].mxu0 }
 0x1ac   :  { %v2646_v45 = vadd.f32 %v2645_v44, %v2644_v42  ;;  %v2667_v46 = vpop.f32.mrb[17].mxu1  ;;  %v2647_v47 = vpop.f32.mrb[18].mxu0 }
 0x1ad   :  { %v2668_v48 = vadd.f32 %v2667_v46, %v2666_v43  ;;  %v2669_v49 = vpop.f32.mrb[18].mxu1  ;;  %v2648_v50 = vpop.f32.mrb[19].mxu0 }
 0x1ae   :  { %v2006_v51 = vadd.f32 %v2646_v45, %v1966_v41  ;;  %v2670_v52 = vpop.f32.mrb[19].mxu1 }
 0x1b0   :  { %v2046_v53 = vadd.f32 %v2668_v48, %v2006_v51 }
 0x1ca   :  { %v2688_v54 = vpop.f32.mrb[20].mxu0 }
 0x1cb   :  { %v2710_v55 = vpop.f32.mrb[20].mxu1  ;;  %v2689_v56 = vpop.f32.mrb[21].mxu0 }
 0x1cc   :  { %v2690_v57 = vadd.f32 %v2689_v56, %v2688_v54  ;;  %v2711_v58 = vpop.f32.mrb[21].mxu1  ;;  %v2691_v59 = vpop.f32.mrb[22].mxu0 }
 0x1cd   :  { %v2712_v60 = vadd.f32 %v2711_v58, %v2710_v55  ;;  %v2713_v61 = vpop.f32.mrb[22].mxu1  ;;  %v2692_v62 = vpop.f32.mrb[23].mxu0 }
 0x1ce   :  { %v2086_v63 = vadd.f32 %v2690_v57, %v2046_v53  ;;  %v2714_v0 = vpop.f32.mrb[23].mxu1 }
 0x1d0   :  { %v2126_v1 = vadd.f32 %v2712_v60, %v2086_v63 }
 0x1d2   :  { %v2131_v2 = vmax.f32 %v2126_v1, 0.0 }
 0x1d4   :  { %v2132_v3 = vpack.c.bf16 %v2131_v2, %v2131_v2 }
 0x1d6   :  { %2742 = vmatmul.mubr.bf16.vlgmr.msra.gmra.mrb[24].mxu0 %v2132_v3 }
 0x2a9   :  { %v2237_v10 = vpop.f32.mrb[24].mxu0 }
 0x2aa   :  { %v2238_v11 = vadd.f32 %v2237_v10, %v2154_v9  ;;  %v2743_v12 = vpop.f32.mrb[25].mxu0 }
 0x2ab   :  { %v2240_v13 = vpop.f32.mrb[26].mxu0 }
 0x2ac   :  { %v2243_v14 = vpack.c.bf16 %v2238_v11, %v2238_v11  ;;  %v2744_v15 = vpop.f32.mrb[27].mxu0 }
 0x2ae   :  { %2244 = vst [vmem:[%s3115_s5] sm:$0xf] %v2243_v14 }
 0x2af   :  { %2249 = vsyncpa [#allocation3], 1 }
 0x2b0   :  { %2250 = vsyncpa [#allocation5], 1 }

</bundles_post_ra>
